<compile_context>
chip_gen: v7x
topology: tpu7x:2x2x1
jax: 0.10.0
libtpu: 0.0.40
codegen_flags: <defaults>
</compile_context>

<pallas_src>
import numpy as np

import jax
import jax.numpy as jnp
from jax import lax
from jax.experimental import pallas as pl
from jax.experimental.pallas import tpu as pltpu

BN_EPS = 1e-5
MATMUL_DTYPE = jnp.bfloat16      # bf16 MXU operands (review item); f32 also works


def _make_block_kernel(N, H, W, C):
    """Fused conv3x3+BN+ReLU -> conv3x3+BN+identity-add+ReLU, all lane-dense."""
    NH, WC = N * H, W * C
    inv_cnt = 1.0 / float(N * H * W)       # BN averages over N*H*W positions

    def kernel(x_ref, w_ref, bn_ref, out_ref):
        x = x_ref[...].astype(jnp.float32)          # (NH, WC) lane-dense
        bn = bn_ref[...]                            # (4, WC): g1,b1,g2,b2 tiled per channel

        # H-edge replication masks, shared by both convs.  Rows index (n, h);
        # a +/-1 sublane roll crosses both the image edge and the batch
        # boundary, and both are fixed by keeping the row's own value there.
        h_idx = lax.broadcasted_iota(jnp.int32, (NH, WC), 0) % H
        top = h_idx == 0
        bot = h_idx == H - 1

        def conv_bn_relu(a, wk, g_row, b_row, residual=None):
            # a: (NH, WC) f32.  w_ref[wk + ky]: (WC, WC) block-banded weight
            # (kx taps + ReplicationPad2d W-edge clamping folded in).
            up = jnp.where(top, a, pltpu.roll(a, shift=1, axis=0))        # reads h-1
            dn = jnp.where(bot, a, pltpu.roll(a, shift=NH - 1, axis=0))   # reads h+1
            acc = jnp.dot(up.astype(MATMUL_DTYPE), w_ref[wk + 0],
                          preferred_element_type=jnp.float32)
            acc = acc + jnp.dot(a.astype(MATMUL_DTYPE), w_ref[wk + 1],
                                preferred_element_type=jnp.float32)
            acc = acc + jnp.dot(dn.astype(MATMUL_DTYPE), w_ref[wk + 2],
                                preferred_element_type=jnp.float32)       # (NH, WC) f32

            # Single-pass BN statistics (training-mode biased batch stats):
            # per-lane sum / sum-of-squares, then a lane-roll butterfly that
            # reduces over the W lane groups AND broadcasts the per-channel
            # totals back to every lane (requires W to be a power of two).
            stats = jnp.concatenate(
                [jnp.sum(acc, axis=0, keepdims=True),
                 jnp.sum(acc * acc, axis=0, keepdims=True)], axis=0)      # (2, WC)
            step = C
            while step < WC:
                stats = stats + pltpu.roll(stats, shift=step, axis=1)
                step *= 2
            mean = stats[0:1, :] * inv_cnt
            var = stats[1:2, :] * inv_cnt - mean * mean
            scale = g_row * lax.rsqrt(var + BN_EPS)
            offset = b_row - mean * scale
            y = acc * scale + offset
            if residual is not None:
                y = y + residual                                          # identity add
            return jnp.maximum(y, 0.0)                                    # ReLU

        y1 = conv_bn_relu(x, 0, bn[0:1, :], bn[1:2, :])
        y2 = conv_bn_relu(y1, 3, bn[2:3, :], bn[3:4, :], residual=x)
        out_ref[...] = y2.astype(out_ref.dtype)

    return kernel


def basic_block_forward(x_nchw, params):
    """BasicBlock.forward (stride=1, downsample=None). x is NCHW like PyTorch.

    params: (w1, g1, b1, w2, g2, b2) with conv weights as (3, 3, Cin, Cout)
    indexed [ky, kx, ci, co] (i.e. PyTorch (Cout,Cin,3,3) transposed) and BN
    gamma/beta as (C,).
    """
    w1, g1, b1, w2, g2, b2 = params
    N, C, H, W = x_nchw.shape
    assert w1.shape == (3, 3, C, C) and w2.shape == (3, 3, C, C), \
        "identity add needs inplanes == planes"
    assert (W & (W - 1)) == 0, "lane butterfly assumes power-of-two W"  # TODO(synk): general W
    NH, WC = N * H, W * C

    # NCHW -> lane-dense (N*H, W*C); stays lane-dense through the whole kernel.
    x = jnp.transpose(x_nchw, (0, 2, 3, 1)).reshape(NH, WC)

    # Static kx-selection matrices: sel[kx, w_in, w_out] = 1 iff input column
    # w_in feeds output column w_out through tap kx, with ReplicationPad2d(1)
    # edge clamping along W folded in.
    sel = np.zeros((3, W, W), np.float32)
    for kx in range(3):
        for wo in range(W):
            sel[kx, min(max(wo + kx - 1, 0), W - 1), wo] = 1.0
    sel = jnp.asarray(sel)

    def banded(wt):  # (3,3,C,C)[ky,kx,ci,co] -> (3, WC, WC) block-banded
        return jnp.einsum("xab,yxij->yaibj", sel, wt).reshape(3, WC, WC)

    # One weight operand (6 banded matrices), bf16 for the MXU; one BN operand
    # with gamma/beta of both layers pre-tiled per channel across the lanes.
    wbig = jnp.concatenate([banded(w1), banded(w2)], axis=0).astype(MATMUL_DTYPE)
    bn = jnp.broadcast_to(
        jnp.stack([g1, b1, g2, b2]).astype(jnp.float32)[:, None, :],
        (4, W, C)).reshape(4, WC)

    out = pl.pallas_call(
        _make_block_kernel(N, H, W, C),
        grid=(1,),
        in_specs=[pl.BlockSpec((NH, WC), lambda i: (0, 0)),
                  pl.BlockSpec((6, WC, WC), lambda i: (0, 0, 0)),
                  pl.BlockSpec((4, WC), lambda i: (0, 0))],
        out_specs=pl.BlockSpec((NH, WC), lambda i: (0, 0)),
        out_shape=jax.ShapeDtypeStruct((NH, WC), x_nchw.dtype),
        compiler_params=pltpu.CompilerParams(
            # TODO(synk): once tiled over N*H row blocks, mark the row axis
            # "parallel" (v7x has 2 TensorCores) and size tiles for 64 MiB VMEM.
            dimension_semantics=("arbitrary",),
            vmem_limit_bytes=32 * 1024 * 1024),
    )(x, wbig, bn)

    return jnp.transpose(out.reshape(N, H, W, C), (0, 3, 1, 2))


def _ref_block(x_nchw, params):
    """Pure-JAX f32 reference of the module's forward (training-mode BN)."""
    w1, g1, b1, w2, g2, b2 = params
    x = jnp.transpose(x_nchw, (0, 2, 3, 1)).astype(jnp.float32)

    def conv(a, wt):                      # ReplicationPad2d(1) + 3x3 valid conv
        n, hh, ww, _ = a.shape
        ap = jnp.pad(a, ((0, 0), (1, 1), (1, 1), (0, 0)), mode="edge")
        out = jnp.zeros((n, hh, ww, wt.shape[-1]), jnp.float32)
        for ky in range(3):
            for kx in range(3):
                out = out + jnp.einsum("nhwc,co->nhwo",
                                       ap[:, ky:ky + hh, kx:kx + ww, :],
                                       wt[ky, kx],
                                       preferred_element_type=jnp.float32)
        return out

    def bn(y, g, b):
        mean = jnp.mean(y, axis=(0, 1, 2), keepdims=True)
        var = jnp.mean((y - mean) ** 2, axis=(0, 1, 2), keepdims=True)
        return ((y - mean) * lax.rsqrt(var + BN_EPS)
                * g.reshape(1, 1, 1, -1) + b.reshape(1, 1, 1, -1))

    y = jnp.maximum(bn(conv(x, w1), g1, b1), 0.0)
    y = jnp.maximum(bn(conv(y, w2), g2, b2) + x, 0.0)
    return jnp.transpose(y, (0, 3, 1, 2))


if __name__ == "__main__":
    key = jax.random.PRNGKey(0)
    N, C, H, W = 2, 8, 16, 16     # inplanes == planes == 8, stride=1 -> W*C = 128
    ks = jax.random.split(key, 7)

    x = jax.random.normal(ks[0], (N, C, H, W), jnp.float32)
    wscale = 1.0 / (3.0 * float(np.sqrt(C)))
    w1 = jax.random.normal(ks[1], (3, 3, C, C), jnp.float32) * wscale
    w2 = jax.random.normal(ks[2], (3, 3, C, C), jnp.float32) * wscale
    g1 = (1.0 + 0.1 * jax.random.normal(ks[3], (C,))).astype(jnp.float32)
    b1 = (0.1 * jax.random.normal(ks[4], (C,))).astype(jnp.float32)
    g2 = (1.0 + 0.1 * jax.random.normal(ks[5], (C,))).astype(jnp.float32)
    b2 = (0.1 * jax.random.normal(ks[6], (C,))).astype(jnp.float32)
    params = (w1, g1, b1, w2, g2, b2)

    out = jax.block_until_ready(jax.jit(basic_block_forward)(x, params))
    assert out.shape == (N, C, H, W) and out.dtype == x.dtype

    ref = _ref_block(x, params)
    # bf16 MXU operands cost roughly 1e-2 absolute through two conv+BN layers;
    # with MATMUL_DTYPE = jnp.float32 the kernel matches the reference <1e-3.
    tol = 5e-2 if MATMUL_DTYPE == jnp.bfloat16 else 1e-3
    assert jnp.allclose(out, ref, atol=tol, rtol=tol), "mismatch vs reference"
    print("KERNEL_OK")
</pallas_src>

<mosaic_0001>
module attributes {stable_mosaic.version = 11 : i64} {
  func.func @kernel(%arg0: i32, %arg1: memref<32x128xf32, #tpu.memory_space<vmem>>, %arg2: memref<6x128x128xbf16, #tpu.memory_space<vmem>>, %arg3: memref<4x128xf32, #tpu.memory_space<vmem>>, %arg4: memref<32x128xf32, #tpu.memory_space<vmem>>) attributes {dimension_semantics = [#tpu.dimension_semantics<arbitrary>], iteration_bounds = array<i64: 1>, scalar_prefetch = 0 : i64, scratch_operands = 0 : i64, tpu.core_type = #tpu.core_type<tc>, window_params = [{pipeline_mode = #tpu.pipeline_mode<synchronous>, transform_indices = @transform_0, window_bounds = array<i64: 32, 128>}, {pipeline_mode = #tpu.pipeline_mode<synchronous>, transform_indices = @transform_1, window_bounds = array<i64: 6, 128, 128>}, {pipeline_mode = #tpu.pipeline_mode<synchronous>, transform_indices = @transform_2, window_bounds = array<i64: 4, 128>}, {pipeline_mode = #tpu.pipeline_mode<synchronous>, transform_indices = @transform_3, window_bounds = array<i64: 32, 128>}]} {
    %c0 = arith.constant 0 : index
    %c0_0 = arith.constant 0 : index
    %0 = vector.load %arg1[%c0, %c0_0] : memref<32x128xf32, #tpu.memory_space<vmem>>, vector<32x128xf32>
    %c0_1 = arith.constant 0 : index
    %c0_2 = arith.constant 0 : index
    %1 = vector.load %arg3[%c0_1, %c0_2] : memref<4x128xf32, #tpu.memory_space<vmem>>, vector<4x128xf32>
    %2 = tpu.iota {dimensions = array<i32: 0>} : vector<32x128xi32>
    %c16_i32 = arith.constant 16 : i32
    %c0_i32 = arith.constant 0 : i32
    %3 = arith.cmpi eq, %c16_i32, %c0_i32 : i32
    %c1_i32 = arith.constant 1 : i32
    %4 = arith.select %3, %c1_i32, %c16_i32 : i32
    %5 = vector.broadcast %4 : i32 to vector<32x128xi32>
    %6 = arith.remsi %2, %5 : vector<32x128xi32>
    %c0_i32_3 = arith.constant 0 : i32
    %7 = vector.broadcast %c0_i32_3 : i32 to vector<32x128xi32>
    %8 = arith.cmpi ne, %6, %7 : vector<32x128xi32>
    %c0_i32_4 = arith.constant 0 : i32
    %9 = vector.broadcast %c0_i32_4 : i32 to vector<32x128xi32>
    %10 = arith.cmpi slt, %6, %9 : vector<32x128xi32>
    %c0_i32_5 = arith.constant 0 : i32
    %11 = arith.cmpi slt, %4, %c0_i32_5 : i32
    %12 = vector.broadcast %11 : i1 to vector<32x128xi1>
    %13 = vector.broadcast %12 : vector<32x128xi1> to vector<32x128xi1>
    %14 = arith.xori %10, %13 : vector<32x128xi1>
    %15 = arith.andi %14, %8 : vector<32x128xi1>
    %16 = vector.broadcast %4 : i32 to vector<32x128xi32>
    %17 = arith.addi %6, %16 : vector<32x128xi32>
    %18 = arith.select %15, %17, %6 : vector<32x128xi1>, vector<32x128xi32>
    %c0_i32_6 = arith.constant 0 : i32
    %19 = vector.broadcast %c0_i32_6 : i32 to vector<32x128xi32>
    %20 = arith.cmpi eq, %18, %19 : vector<32x128xi32>
    %c15_i32 = arith.constant 15 : i32
    %21 = vector.broadcast %c15_i32 : i32 to vector<32x128xi32>
    %22 = arith.cmpi eq, %18, %21 : vector<32x128xi32>
    %23 = vector.extract_strided_slice %1 {offsets = [0, 0], sizes = [1, 128], strides = [1, 1]} : vector<4x128xf32> to vector<1x128xf32>
    %24 = vector.extract_strided_slice %1 {offsets = [1, 0], sizes = [1, 128], strides = [1, 1]} : vector<4x128xf32> to vector<1x128xf32>
    %c1_i32_7 = arith.constant 1 : i32
    %25 = tpu.dynamic_rotate %0 by %c1_i32_7 dim 0 : vector<32x128xf32>, i32 -> vector<32x128xf32>
    %26 = arith.select %20, %0, %25 : vector<32x128xi1>, vector<32x128xf32>
    %c31_i32 = arith.constant 31 : i32
    %27 = tpu.dynamic_rotate %0 by %c31_i32 dim 0 : vector<32x128xf32>, i32 -> vector<32x128xf32>
    %28 = arith.select %22, %0, %27 : vector<32x128xi1>, vector<32x128xf32>
    %29 = arith.truncf %26 : vector<32x128xf32> to vector<32x128xbf16>
    %c0_8 = arith.constant 0 : index
    %c0_9 = arith.constant 0 : index
    %c0_10 = arith.constant 0 : index
    %30 = vector.load %arg2[%c0_8, %c0_9, %c0_10] : memref<6x128x128xbf16, #tpu.memory_space<vmem>>, vector<1x128x128xbf16>
    %31 = vector.shape_cast %30 : vector<1x128x128xbf16> to vector<128x128xbf16>
    %cst = arith.constant dense<0.000000e+00> : vector<32x128xf32>
    %32 = tpu.matmul %29, %31, %cst {dimension_numbers = #tpu.dot_dimension_numbers<[1], [0], [0], [1], [0, 0, 1, 1], [], []>} : vector<32x128xbf16>, vector<128x128xbf16>, vector<32x128xf32> -> vector<32x128xf32>
    %33 = arith.truncf %0 : vector<32x128xf32> to vector<32x128xbf16>
    %c1 = arith.constant 1 : index
    %c0_11 = arith.constant 0 : index
    %c0_12 = arith.constant 0 : index
    %34 = vector.load %arg2[%c1, %c0_11, %c0_12] : memref<6x128x128xbf16, #tpu.memory_space<vmem>>, vector<1x128x128xbf16>
    %35 = vector.shape_cast %34 : vector<1x128x128xbf16> to vector<128x128xbf16>
    %cst_13 = arith.constant dense<0.000000e+00> : vector<32x128xf32>
    %36 = tpu.matmul %33, %35, %cst_13 {dimension_numbers = #tpu.dot_dimension_numbers<[1], [0], [0], [1], [0, 0, 1, 1], [], []>} : vector<32x128xbf16>, vector<128x128xbf16>, vector<32x128xf32> -> vector<32x128xf32>
    %37 = arith.addf %32, %36 : vector<32x128xf32>
    %38 = arith.truncf %28 : vector<32x128xf32> to vector<32x128xbf16>
    %c2 = arith.constant 2 : index
    %c0_14 = arith.constant 0 : index
    %c0_15 = arith.constant 0 : index
    %39 = vector.load %arg2[%c2, %c0_14, %c0_15] : memref<6x128x128xbf16, #tpu.memory_space<vmem>>, vector<1x128x128xbf16>
    %40 = vector.shape_cast %39 : vector<1x128x128xbf16> to vector<128x128xbf16>
    %cst_16 = arith.constant dense<0.000000e+00> : vector<32x128xf32>
    %41 = tpu.matmul %38, %40, %cst_16 {dimension_numbers = #tpu.dot_dimension_numbers<[1], [0], [0], [1], [0, 0, 1, 1], [], []>} : vector<32x128xbf16>, vector<128x128xbf16>, vector<32x128xf32> -> vector<32x128xf32>
    %42 = arith.addf %37, %41 : vector<32x128xf32>
    %cst_17 = arith.constant dense<0.000000e+00> : vector<128xf32>
    %43 = vector.multi_reduction <add>, %42, %cst_17 [0] : vector<32x128xf32> to vector<128xf32>
    %44 = vector.shape_cast %43 : vector<128xf32> to vector<1x128xf32>
    %45 = arith.mulf %42, %42 : vector<32x128xf32>
    %cst_18 = arith.constant dense<0.000000e+00> : vector<128xf32>
    %46 = vector.multi_reduction <add>, %45, %cst_18 [0] : vector<32x128xf32> to vector<128xf32>
    %47 = vector.shape_cast %46 : vector<128xf32> to vector<1x128xf32>
    %48 = tpu.concatenate %44, %47 in 0 : vector<1x128xf32>, vector<1x128xf32> -> vector<2x128xf32>
    %c8_i32 = arith.constant 8 : i32
    %49 = tpu.dynamic_rotate %48 by %c8_i32 dim 1 : vector<2x128xf32>, i32 -> vector<2x128xf32>
    %50 = arith.addf %48, %49 : vector<2x128xf32>
    %c16_i32_19 = arith.constant 16 : i32
    %51 = tpu.dynamic_rotate %50 by %c16_i32_19 dim 1 : vector<2x128xf32>, i32 -> vector<2x128xf32>
    %52 = arith.addf %50, %51 : vector<2x128xf32>
    %c32_i32 = arith.constant 32 : i32
    %53 = tpu.dynamic_rotate %52 by %c32_i32 dim 1 : vector<2x128xf32>, i32 -> vector<2x128xf32>
    %54 = arith.addf %52, %53 : vector<2x128xf32>
    %c64_i32 = arith.constant 64 : i32
    %55 = tpu.dynamic_rotate %54 by %c64_i32 dim 1 : vector<2x128xf32>, i32 -> vector<2x128xf32>
    %56 = arith.addf %54, %55 : vector<2x128xf32>
    %57 = vector.extract_strided_slice %56 {offsets = [0, 0], sizes = [1, 128], strides = [1, 1]} : vector<2x128xf32> to vector<1x128xf32>
    %cst_20 = arith.constant 0.001953125 : f32
    %58 = vector.broadcast %cst_20 : f32 to vector<1x128xf32>
    %59 = arith.mulf %57, %58 : vector<1x128xf32>
    %60 = vector.extract_strided_slice %56 {offsets = [1, 0], sizes = [1, 128], strides = [1, 1]} : vector<2x128xf32> to vector<1x128xf32>
    %cst_21 = arith.constant 0.001953125 : f32
    %61 = vector.broadcast %cst_21 : f32 to vector<1x128xf32>
    %62 = arith.mulf %60, %61 : vector<1x128xf32>
    %63 = arith.mulf %59, %59 : vector<1x128xf32>
    %64 = arith.subf %62, %63 : vector<1x128xf32>
    %cst_22 = arith.constant 9.99999974E-6 : f32
    %65 = vector.broadcast %cst_22 : f32 to vector<1x128xf32>
    %66 = arith.addf %64, %65 : vector<1x128xf32>
    %67 = math.rsqrt %66 : vector<1x128xf32>
    %68 = arith.mulf %23, %67 : vector<1x128xf32>
    %69 = arith.mulf %59, %68 : vector<1x128xf32>
    %70 = arith.subf %24, %69 : vector<1x128xf32>
    %71 = vector.broadcast %68 : vector<1x128xf32> to vector<32x128xf32>
    %72 = arith.mulf %42, %71 : vector<32x128xf32>
    %73 = vector.broadcast %70 : vector<1x128xf32> to vector<32x128xf32>
    %74 = arith.addf %72, %73 : vector<32x128xf32>
    %cst_23 = arith.constant 0.000000e+00 : f32
    %75 = vector.broadcast %cst_23 : f32 to vector<32x128xf32>
    %76 = arith.maximumf %74, %75 : vector<32x128xf32>
    %77 = vector.extract_strided_slice %1 {offsets = [2, 0], sizes = [1, 128], strides = [1, 1]} : vector<4x128xf32> to vector<1x128xf32>
    %78 = vector.extract_strided_slice %1 {offsets = [3, 0], sizes = [1, 128], strides = [1, 1]} : vector<4x128xf32> to vector<1x128xf32>
    %c1_i32_24 = arith.constant 1 : i32
    %79 = tpu.dynamic_rotate %76 by %c1_i32_24 dim 0 : vector<32x128xf32>, i32 -> vector<32x128xf32>
    %80 = arith.select %20, %76, %79 : vector<32x128xi1>, vector<32x128xf32>
    %c31_i32_25 = arith.constant 31 : i32
    %81 = tpu.dynamic_rotate %76 by %c31_i32_25 dim 0 : vector<32x128xf32>, i32 -> vector<32x128xf32>
    %82 = arith.select %22, %76, %81 : vector<32x128xi1>, vector<32x128xf32>
    %83 = arith.truncf %80 : vector<32x128xf32> to vector<32x128xbf16>
    %c3 = arith.constant 3 : index
    %c0_26 = arith.constant 0 : index
    %c0_27 = arith.constant 0 : index
    %84 = vector.load %arg2[%c3, %c0_26, %c0_27] : memref<6x128x128xbf16, #tpu.memory_space<vmem>>, vector<1x128x128xbf16>
    %85 = vector.shape_cast %84 : vector<1x128x128xbf16> to vector<128x128xbf16>
    %cst_28 = arith.constant dense<0.000000e+00> : vector<32x128xf32>
    %86 = tpu.matmul %83, %85, %cst_28 {dimension_numbers = #tpu.dot_dimension_numbers<[1], [0], [0], [1], [0, 0, 1, 1], [], []>} : vector<32x128xbf16>, vector<128x128xbf16>, vector<32x128xf32> -> vector<32x128xf32>
    %87 = arith.truncf %76 : vector<32x128xf32> to vector<32x128xbf16>
    %c4 = arith.constant 4 : index
    %c0_29 = arith.constant 0 : index
    %c0_30 = arith.constant 0 : index
    %88 = vector.load %arg2[%c4, %c0_29, %c0_30] : memref<6x128x128xbf16, #tpu.memory_space<vmem>>, vector<1x128x128xbf16>
    %89 = vector.shape_cast %88 : vector<1x128x128xbf16> to vector<128x128xbf16>
    %cst_31 = arith.constant dense<0.000000e+00> : vector<32x128xf32>
    %90 = tpu.matmul %87, %89, %cst_31 {dimension_numbers = #tpu.dot_dimension_numbers<[1], [0], [0], [1], [0, 0, 1, 1], [], []>} : vector<32x128xbf16>, vector<128x128xbf16>, vector<32x128xf32> -> vector<32x128xf32>
    %91 = arith.addf %86, %90 : vector<32x128xf32>
    %92 = arith.truncf %82 : vector<32x128xf32> to vector<32x128xbf16>
    %c5 = arith.constant 5 : index
    %c0_32 = arith.constant 0 : index
    %c0_33 = arith.constant 0 : index
    %93 = vector.load %arg2[%c5, %c0_32, %c0_33] : memref<6x128x128xbf16, #tpu.memory_space<vmem>>, vector<1x128x128xbf16>
    %94 = vector.shape_cast %93 : vector<1x128x128xbf16> to vector<128x128xbf16>
    %cst_34 = arith.constant dense<0.000000e+00> : vector<32x128xf32>
    %95 = tpu.matmul %92, %94, %cst_34 {dimension_numbers = #tpu.dot_dimension_numbers<[1], [0], [0], [1], [0, 0, 1, 1], [], []>} : vector<32x128xbf16>, vector<128x128xbf16>, vector<32x128xf32> -> vector<32x128xf32>
    %96 = arith.addf %91, %95 : vector<32x128xf32>
    %cst_35 = arith.constant dense<0.000000e+00> : vector<128xf32>
    %97 = vector.multi_reduction <add>, %96, %cst_35 [0] : vector<32x128xf32> to vector<128xf32>
    %98 = vector.shape_cast %97 : vector<128xf32> to vector<1x128xf32>
    %99 = arith.mulf %96, %96 : vector<32x128xf32>
    %cst_36 = arith.constant dense<0.000000e+00> : vector<128xf32>
    %100 = vector.multi_reduction <add>, %99, %cst_36 [0] : vector<32x128xf32> to vector<128xf32>
    %101 = vector.shape_cast %100 : vector<128xf32> to vector<1x128xf32>
    %102 = tpu.concatenate %98, %101 in 0 : vector<1x128xf32>, vector<1x128xf32> -> vector<2x128xf32>
    %c8_i32_37 = arith.constant 8 : i32
    %103 = tpu.dynamic_rotate %102 by %c8_i32_37 dim 1 : vector<2x128xf32>, i32 -> vector<2x128xf32>
    %104 = arith.addf %102, %103 : vector<2x128xf32>
    %c16_i32_38 = arith.constant 16 : i32
    %105 = tpu.dynamic_rotate %104 by %c16_i32_38 dim 1 : vector<2x128xf32>, i32 -> vector<2x128xf32>
    %106 = arith.addf %104, %105 : vector<2x128xf32>
    %c32_i32_39 = arith.constant 32 : i32
    %107 = tpu.dynamic_rotate %106 by %c32_i32_39 dim 1 : vector<2x128xf32>, i32 -> vector<2x128xf32>
    %108 = arith.addf %106, %107 : vector<2x128xf32>
    %c64_i32_40 = arith.constant 64 : i32
    %109 = tpu.dynamic_rotate %108 by %c64_i32_40 dim 1 : vector<2x128xf32>, i32 -> vector<2x128xf32>
    %110 = arith.addf %108, %109 : vector<2x128xf32>
    %111 = vector.extract_strided_slice %110 {offsets = [0, 0], sizes = [1, 128], strides = [1, 1]} : vector<2x128xf32> to vector<1x128xf32>
    %cst_41 = arith.constant 0.001953125 : f32
    %112 = vector.broadcast %cst_41 : f32 to vector<1x128xf32>
    %113 = arith.mulf %111, %112 : vector<1x128xf32>
    %114 = vector.extract_strided_slice %110 {offsets = [1, 0], sizes = [1, 128], strides = [1, 1]} : vector<2x128xf32> to vector<1x128xf32>
    %cst_42 = arith.constant 0.001953125 : f32
    %115 = vector.broadcast %cst_42 : f32 to vector<1x128xf32>
    %116 = arith.mulf %114, %115 : vector<1x128xf32>
    %117 = arith.mulf %113, %113 : vector<1x128xf32>
    %118 = arith.subf %116, %117 : vector<1x128xf32>
    %cst_43 = arith.constant 9.99999974E-6 : f32
    %119 = vector.broadcast %cst_43 : f32 to vector<1x128xf32>
    %120 = arith.addf %118, %119 : vector<1x128xf32>
    %121 = math.rsqrt %120 : vector<1x128xf32>
    %122 = arith.mulf %77, %121 : vector<1x128xf32>
    %123 = arith.mulf %113, %122 : vector<1x128xf32>
    %124 = arith.subf %78, %123 : vector<1x128xf32>
    %125 = vector.broadcast %122 : vector<1x128xf32> to vector<32x128xf32>
    %126 = arith.mulf %96, %125 : vector<32x128xf32>
    %127 = vector.broadcast %124 : vector<1x128xf32> to vector<32x128xf32>
    %128 = arith.addf %126, %127 : vector<32x128xf32>
    %129 = arith.addf %128, %0 : vector<32x128xf32>
    %cst_44 = arith.constant 0.000000e+00 : f32
    %130 = vector.broadcast %cst_44 : f32 to vector<32x128xf32>
    %131 = arith.maximumf %129, %130 : vector<32x128xf32>
    %c0_45 = arith.constant 0 : index
    %c0_46 = arith.constant 0 : index
    %132 = vector.load %arg4[%c0_45, %c0_46] : memref<32x128xf32, #tpu.memory_space<vmem>>, vector<32x128xf32>
    tpu.vector_store %arg4[%c0_45, %c0_46], %131 {strides = array<i32>} : memref<32x128xf32, #tpu.memory_space<vmem>>, vector<32x128xf32>,
    return
  }
  func.func @transform_0(%arg0: i32) -> (i32, i32) {
    %c0_i32 = arith.constant 0 : i32
    %c0_i32_0 = arith.constant 0 : i32
    %c0_i32_1 = arith.constant 0 : i32
    return %c0_i32, %c0_i32_0 : i32, i32
  }
  func.func @transform_1(%arg0: i32) -> (i32, i32, i32) {
    %c0_i32 = arith.constant 0 : i32
    %c0_i32_0 = arith.constant 0 : i32
    %c0_i32_1 = arith.constant 0 : i32
    %c0_i32_2 = arith.constant 0 : i32
    return %c0_i32, %c0_i32_0, %c0_i32_1 : i32, i32, i32
  }
  func.func @transform_2(%arg0: i32) -> (i32, i32) {
    %c0_i32 = arith.constant 0 : i32
    %c0_i32_0 = arith.constant 0 : i32
    %c0_i32_1 = arith.constant 0 : i32
    return %c0_i32, %c0_i32_0 : i32, i32
  }
  func.func @transform_3(%arg0: i32) -> (i32, i32) {
    %c0_i32 = arith.constant 0 : i32
    %c0_i32_0 = arith.constant 0 : i32
    %c0_i32_1 = arith.constant 0 : i32
    return %c0_i32, %c0_i32_0 : i32, i32
  }
}

</mosaic_0001>

<bundles_post_ra>
// kernel: basic_block_forward.1
= control target key start
LH: loop header
LB: loop body
LE: loop exit
PB: predicated region body
PF: predicated region fallthrough
CT: control target
= control target key end

     0   :  { %v20_v8 = vlaneseq  ;;  %vm480_vm6 = vcmask 1040384   ;;  %s1374_s12 = smov 8   ;;  %s1375_s13 = smov 16   ;;  %s1713_s1 = inlined_call_operand.vmem [shape: bf16[6,128,128], index: 1, kind: input, shape index: {}]   ;;  %s1714_s0 = inlined_call_operand.vmem [shape: f32[32,128], index: 0, kind: input, shape index: {}]   ;;  %s1715_s2 = inlined_call_operand.vmem [shape: f32[4,128], index: 2, kind: input, shape index: {}]   ;;  %s1716_s3 = inlined_call_operand.vmem [shape: f32[32,128], index: 3, kind: output, shape index: {}]  }
   0x1   :  { %v1322_v0 = vld [vmem:[%s1713_s1 + $0x40] sm:$0xff]   ;;  %v1323_v1 = vld [vmem:[%s1713_s1 + $0x48] sm:$0xff]   ;;  %v1324_v2 = vld [vmem:[%s1713_s1 + $0x50] sm:$0xff]   ;;  %s1376_s14 = smov 32   ;;  %s1377_s19 = smov 64  }
   0x2   :  { %1182 = vmatprep.subr.bf16.mxu0 %v1322_v0  ;;  %v1325_v3 = vld [vmem:[%s1713_s1 + $0x58] sm:$0xff]   ;;  %v1413_v4 = vld [vmem:[%s1714_s0] sm:$0xff]  ;;  %v1418_v5 = vld [vmem:[%s1714_s0 + $0x8] sm:$0xff]  ;;  %v1428_v10 = vshrl.u32 %v20_v8, 7 }
   0x3   :  { %1183 = vmatpush3.bf16.msra.mxu0 %v1322_v0  ;;  %v125_v6 = vpack.c.bf16 %v1418_v5, %v1413_v4  ;;  %v1326_v7 = vld [vmem:[%s1713_s1 + $0x60] sm:$0xff]   ;;  %v1327_v9 = vld [vmem:[%s1713_s1 + $0x68] sm:$0xff]   ;;  %v1328_v11 = vld [vmem:[%s1713_s1 + $0x70] sm:$0xff]   ;;  %v81_v14 = vrot.slane %v1413_v4, 7  ;;  %v82_v17 = vrot.slane %v1418_v5, 7  ;;  %v95_v37 = vrot.slane %v1418_v5, 1 }
   0x4   :  { %1184 = vmatprep.subr.bf16.mxu0 %v1323_v1  ;;  %v1436_v12 = vld [vmem:[%s1714_s0 + $0x18] sm:$0xff]  ;;  %v29_v13 = vand.u32 15, %v1428_v10  ;;  %vm85_vm0 = vcmp.lt.s32.totalorder %v1428_v10, 1  ;;  %v1449_v18 = vld [vmem:[%s1714_s0 + $0x10] sm:$0xff]  ;;  %v1330_v21 = vld [vmem:[%s1713_s1] sm:$0xff]   ;;  %v23_v31 = vadd.s32 16, %v1428_v10 }
   0x5   :  { %1198 = vmatprep.mubr.bf16.mxu0 %v125_v6  ;;  %v84_v15 = vrot.slane %v1436_v12, 7  ;;  %v1329_v16 = vld [vmem:[%s1713_s1 + $0x78] sm:$0xff]   ;;  %v88_v22 = vsel %vm85_vm0, %v81_v14, %v82_v17  ;;  %v126_v24 = vpack.c.bf16 %v1436_v12, %v1449_v18  ;;  %v1331_v25 = vld [vmem:[%s1713_s1 + $0x8] sm:$0xff]   ;;  %v1332_v27 = vld [vmem:[%s1713_s1 + $0x10] sm:$0xff]   ;;  %v22_v32 = vadd.s32 8, %v1428_v10 }
   0x6   :  { %vm1451_vm1 = vcmp.eq.s32.totalorder %v29_v13, 0  ;;  %v1333_v28 = vld [vmem:[%s1713_s1 + $0x18] sm:$0xff]   ;;  %v1334_v29 = vld [vmem:[%s1713_s1 + $0x20] sm:$0xff]   ;;  %v1335_v30 = vld [vmem:[%s1713_s1 + $0x28] sm:$0xff]   ;;  %v43_v34 = vand.u32 15, %v23_v31  ;;  %v83_v35 = vrot.slane %v1449_v18, 7 }
   0x7   :  { %1185 = vmatpush3.bf16.msra.mxu0 %v1323_v1  ;;  %v89_v20 = vsel %vm85_vm0, %v84_v15, %v81_v14  ;;  %v1336_v33 = vld [vmem:[%s1713_s1 + $0x30] sm:$0xff]   ;;  %v36_v36 = vand.u32 15, %v22_v32  ;;  %v96_v38 = vrot.slane %v1449_v18, 1  ;;  %vm98_vm2 = vcmp.lt.s32.totalorder %v1428_v10, 7  ;;  %v1337_v39 = vld [vmem:[%s1713_s1 + $0x38] sm:$0xff]   ;;  %v1338_v47 = vld [vmem:[%s1713_s1 + $0x80] sm:$0xff]  }
   0x8   :  { %1186 = vmatprep.subr.bf16.mxu0 %v1324_v2  ;;  %v90_v23 = vsel %vm1451_vm1, %v1413_v4, %v89_v20  ;;  %vm1494_vm3 = vcmp.eq.s32.totalorder %v43_v34, 0  ;;  %v87_v41 = vsel %vm85_vm0, %v82_v17, %v83_v35  ;;  %v94_v42 = vrot.slane %v1413_v4, 1  ;;  %v1339_v52 = vld [vmem:[%s1713_s1 + $0x88] sm:$0xff]   ;;  %v1340_v53 = vld [vmem:[%s1713_s1 + $0x90] sm:$0xff]   ;;  %v1341_v54 = vld [vmem:[%s1713_s1 + $0x98] sm:$0xff]  }
   0x9   :  { %v107_v26 = vpack.c.bf16 %v88_v22, %v90_v23  ;;  %vm1501_vm4 = vcmp.eq.s32.totalorder %v36_v36, 15  ;;  %v100_v44 = vsel %vm98_vm2, %v95_v37, %v96_v38  ;;  %v86_v45 = vsel %vm85_vm0, %v83_v35, %v84_v15  ;;  %v1342_v55 = vld [vmem:[%s1713_s1 + $0xa0] sm:$0xff]   ;;  %v1343_v56 = vld [vmem:[%s1713_s1 + $0xa8] sm:$0xff]   ;;  %v1344_v58 = vld [vmem:[%s1713_s1 + $0xb0] sm:$0xff]  }
   0xa   :  { %v92_v46 = vsel %vm1494_vm3, %v1449_v18, %v87_v41  ;;  %v101_v48 = vsel %vm98_vm2, %v94_v42, %v95_v37  ;;  %v104_v49 = vsel %vm1501_vm4, %v1418_v5, %v100_v44  ;;  %v24_v57 = vadd.s32 24, %v1428_v10  ;;  %v1345_v61 = vld [vmem:[%s1713_s1 + $0xb8] sm:$0xff]   ;;  %v1346_v41 = vld [vmem:[%s1713_s1 + $0x100] sm:$0xff]   ;;  %v1359_v62 = vld [vmem:[%s1713_s1 + $0xe8] sm:$0xff]  }
   0xb   :  { %1187 = vmatpush3.bf16.msra.mxu0 %v1324_v2  ;;  %v108_v50 = vpack.c.bf16 %v86_v45, %v92_v46  ;;  %v338_v51 = vpack.c.bf16 %v104_v49, %v101_v48  ;;  %v97_v60 = vrot.slane %v1436_v12, 1  ;;  %1242 = vmatprep.subr.bf16.mxu1 %v1346_v41  ;;  %v1347_v45 = vld [vmem:[%s1713_s1 + $0x108] sm:$0xff]   ;;  %v1348_v46 = vld [vmem:[%s1713_s1 + $0x110] sm:$0xff]   ;;  %v1350_v48 = vld [vmem:[%s1713_s1 + $0x120] sm:$0xff]  }
   0xc   :  { %1188 = vmatprep.subr.bf16.mxu0 %v1325_v3  ;;  %v50_v59 = vand.u32 15, %v24_v57  ;;  %1243 = vmatpush3.bf16.msra.mxu1 %v1346_v41  ;;  %v1351_v49 = vld [vmem:[%s1713_s1 + $0x128] sm:$0xff]   ;;  %v1358_v43 = vld [vmem:[%s1713_s1 + $0xe0] sm:$0xff]  }
   0xd   :  { %v102_v63 = vsel %vm98_vm2, %v97_v60, %v94_v42  ;;  %v99_v0 = vsel %vm98_vm2, %v96_v38, %v97_v60  ;;  %1244 = vmatprep.subr.bf16.mxu1 %v1347_v45 }
   0xe   :  { %vm1543_vm5 = vcmp.eq.s32.totalorder %v50_v59, 15 }
   0xf   :  { %1189 = vmatpush3.bf16.msra.mxu0 %v1325_v3  ;;  %v106_v1 = vsel %vm1543_vm5, %v1436_v12, %v102_v63 }
  0x10   :  { %1190 = vmatprep.subr.bf16.mxu0 %v1326_v7  ;;  %v339_v2 = vpack.c.bf16 %v106_v1, %v99_v0  ;;  %1245 = vmatpush3.bf16.msra.mxu1 %v1347_v45  ;;  %v513_v0 = vsub.s32 0, %v1428_v10 }
  0x11   :  { %1246 = vmatprep.subr.bf16.mxu1 %v1348_v46 }
  0x13   :  { %1191 = vmatpush3.bf16.msra.mxu0 %v1326_v7 }
  0x14   :  { %1192 = vmatprep.subr.bf16.mxu0 %v1327_v9  ;;  %1247 = vmatpush3.bf16.msra.mxu1 %v1348_v46 }
  0x17   :  { %1193 = vmatpush3.bf16.msra.mxu0 %v1327_v9 }
  0x18   :  { %1194 = vmatprep.subr.bf16.mxu0 %v1328_v11 }
  0x1b   :  { %1195 = vmatpush3.bf16.msra.mxu0 %v1328_v11 }
  0x1c   :  { %1196 = vmatprep.subr.bf16.mxu0 %v1329_v16 }
  0x1f   :  { %1197 = vmatpush3.bf16.msra.mxu0 %v1329_v16 }
  0x20   :  { %1202 = vmatprep.subr.bf16.mxu0 %v1330_v21 }
  0x22   :  { %1199 = vmatmul.mubr.bf16.vlgmr.msra.gmra.mrb[0].mxu0 %v126_v24 }
  0x23   :  { %1203 = vmatpush3.bf16.msra.mxu0 %v1330_v21  ;;  %1218 = vmatprep.mubr.bf16.mxu0 %v107_v26 }
  0x24   :  { %1204 = vmatprep.subr.bf16.mxu0 %v1331_v25 }
  0x27   :  { %1205 = vmatpush3.bf16.msra.mxu0 %v1331_v25 }
  0x28   :  { %1206 = vmatprep.subr.bf16.mxu0 %v1332_v27 }
  0x2b   :  { %1207 = vmatpush3.bf16.msra.mxu0 %v1332_v27 }
  0x2c   :  { %1208 = vmatprep.subr.bf16.mxu0 %v1333_v28 }
  0x2f   :  { %1209 = vmatpush3.bf16.msra.mxu0 %v1333_v28 }
  0x30   :  { %1210 = vmatprep.subr.bf16.mxu0 %v1334_v29 }
  0x33   :  { %1211 = vmatpush3.bf16.msra.mxu0 %v1334_v29 }
  0x34   :  { %1212 = vmatprep.subr.bf16.mxu0 %v1335_v30 }
  0x37   :  { %1213 = vmatpush3.bf16.msra.mxu0 %v1335_v30 }
  0x38   :  { %1214 = vmatprep.subr.bf16.mxu0 %v1336_v33 }
  0x3b   :  { %1215 = vmatpush3.bf16.msra.mxu0 %v1336_v33 }
  0x3c   :  { %1216 = vmatprep.subr.bf16.mxu0 %v1337_v39 }
  0x3f   :  { %1217 = vmatpush3.bf16.msra.mxu0 %v1337_v39 }
  0x40   :  { %1222 = vmatprep.subr.bf16.mxu0 %v1338_v47 }
  0x42   :  { %1219 = vmatmul.mubr.bf16.vlgmr.msra.gmra.mrb[0].mxu0 %v108_v50  ;;  %v1352_v50 = vld [vmem:[%s1713_s1 + $0x130] sm:$0xff]  }
  0x43   :  { %1223 = vmatpush3.bf16.msra.mxu0 %v1338_v47  ;;  %1238 = vmatprep.mubr.bf16.mxu0 %v338_v51  ;;  %v1349_v47 = vld [vmem:[%s1713_s1 + $0x118] sm:$0xff]  }
  0x44   :  { %1224 = vmatprep.subr.bf16.mxu0 %v1339_v52  ;;  %1248 = vmatprep.subr.bf16.mxu1 %v1349_v47  ;;  %v1353_v51 = vld [vmem:[%s1713_s1 + $0x138] sm:$0xff]  }
  0x45   :  { %1249 = vmatpush3.bf16.msra.mxu1 %v1349_v47 }
  0x46   :  { %1250 = vmatprep.subr.bf16.mxu1 %v1350_v48 }
  0x47   :  { %1225 = vmatpush3.bf16.msra.mxu0 %v1339_v52  ;;  %v1354_v52 = vld [vmem:[%s1713_s1 + $0xc0] sm:$0xff]  }
  0x48   :  { %1226 = vmatprep.subr.bf16.mxu0 %v1340_v53 }
  0x49   :  { %1251 = vmatpush3.bf16.msra.mxu1 %v1350_v48 }
  0x4a   :  { %1252 = vmatprep.subr.bf16.mxu1 %v1351_v49 }
  0x4b   :  { %1227 = vmatpush3.bf16.msra.mxu0 %v1340_v53 }
  0x4c   :  { %1228 = vmatprep.subr.bf16.mxu0 %v1341_v54 }
  0x4d   :  { %1253 = vmatpush3.bf16.msra.mxu1 %v1351_v49  ;;  %v1356_v49 = vld [vmem:[%s1713_s1 + $0xd0] sm:$0xff]  }
  0x4e   :  { %1254 = vmatprep.subr.bf16.mxu1 %v1352_v50 }
  0x4f   :  { %1229 = vmatpush3.bf16.msra.mxu0 %v1341_v54 }
  0x50   :  { %1230 = vmatprep.subr.bf16.mxu0 %v1342_v55 }
  0x51   :  { %1255 = vmatpush3.bf16.msra.mxu1 %v1352_v50 }
  0x52   :  { %1256 = vmatprep.subr.bf16.mxu1 %v1353_v51 }
  0x53   :  { %1231 = vmatpush3.bf16.msra.mxu0 %v1342_v55 }
  0x54   :  { %1232 = vmatprep.subr.bf16.mxu0 %v1343_v56 }
  0x55   :  { %1257 = vmatpush3.bf16.msra.mxu1 %v1353_v51 }
  0x56   :  { %1262 = vmatprep.subr.bf16.mxu1 %v1354_v52 }
  0x57   :  { %1233 = vmatpush3.bf16.msra.mxu0 %v1343_v56 }
  0x58   :  { %1234 = vmatprep.subr.bf16.mxu0 %v1344_v58 }
  0x5b   :  { %1235 = vmatpush3.bf16.msra.mxu0 %v1344_v58 }
  0x5c   :  { %1236 = vmatprep.subr.bf16.mxu0 %v1345_v61 }
  0x5f   :  { %1237 = vmatpush3.bf16.msra.mxu0 %v1345_v61  ;;  %v1609_v61 = vld [vmem:[%s1715_s2] sm:$0xf] }
  0x62   :  { %1239 = vmatmul.mubr.bf16.vlgmr.msra.gmra.mrb[0].mxu0 %v339_v2 }
 0x135   :  { %v1554_v3 = vpop.f32.mrb[0].mxu0 }
 0x136   :  { %v1556_v6 = vpop.f32.mrb[1].mxu0  ;;  %v469_v14 = vmul.f32 %v1554_v3, %v1554_v3 }
 0x137   :  { %v1558_v7 = vpop.f32.mrb[2].mxu0  ;;  %v467_v9 = vmul.f32 %v1556_v6, %v1556_v6 }
 0x138   :  { %v1560_v8 = vpop.f32.mrb[3].mxu0  ;;  %v470_v17 = vmul.f32 %v1558_v7, %v1558_v7 }
 0x139   :  { %v458_v11 = vadd.f32 %v1560_v8, %v1556_v6  ;;  %v468_v13 = vmul.f32 %v1560_v8, %v1560_v8 }
 0x13b   :  { %v459_v15 = vadd.f32 %v1554_v3, %v458_v11  ;;  %v471_v16 = vadd.f32 %v468_v13, %v467_v9  ;;  %v521_v11 = vsub.s32 1, %v1428_v10 }
 0x13d   :  { %v460_v20 = vadd.f32 %v1558_v7, %v459_v15  ;;  %v472_v21 = vadd.f32 %v471_v16, %v469_v14 }
 0x13f   :  { %v461_v22 = vrot.slane %v460_v20, 4  ;;  %v473_v23 = vadd.f32 %v472_v21, %v470_v17 }
 0x141   :  { %v462_v24 = vadd.f32 %v461_v22, %v460_v20  ;;  %v474_v25 = vrot.slane %v473_v23, 4 }
 0x143   :  { %v463_v26 = vrot.slane %v462_v24, 2  ;;  %v475_v27 = vadd.f32 %v474_v25, %v473_v23 }
 0x145   :  { %v464_v28 = vadd.f32 %v463_v26, %v462_v24  ;;  %v476_v29 = vrot.slane %v475_v27, 2 }
 0x147   :  { %v465_v30 = vrot.slane %v464_v28, 1  ;;  %v477_v31 = vadd.f32 %v476_v29, %v475_v27 }
 0x149   :  { %v478_v32 = vrot.slane %v477_v31, 1  ;;  %v466_v33 = vadd.f32 %v465_v30, %v464_v28 }
 0x14b   :  { %v479_v34 = vadd.f32 %v478_v32, %v477_v31 }
 0x14d   :  { %v481_v35 = vsel %vm480_vm6, %v466_v33, %v479_v34 }
 0x14e   :  { %482 = vrot.lane.b32.xlu0 %v481_v35, %s1374_s12 }
 0x1c0   :  { %v483_v36 = vpop.permute.xlu0 %482 }
 0x1c1   :  { %v484_v37 = vadd.f32 %v483_v36, %v481_v35 }
 0x1c3   :  { %485 = vrot.lane.b32.xlu0 %v484_v37, %s1375_s13 }
 0x235   :  { %v486_v38 = vpop.permute.xlu0 %485 }
 0x236   :  { %v487_v39 = vadd.f32 %v486_v38, %v484_v37 }
 0x238   :  { %488 = vrot.lane.b32.xlu1 %v487_v39, %s1376_s14 }
 0x2aa   :  { %v489_v42 = vpop.permute.xlu1 %488 }
 0x2ab   :  { %v490_v44 = vadd.f32 %v489_v42, %v487_v39 }
 0x2ad   :  { %491 = vrot.lane.b32.xlu1 %v490_v44, %s1377_s19 }
 0x31f   :  { %v492_v53 = vpop.permute.xlu1 %491 }
 0x320   :  { %v493_v54 = vadd.f32 %v492_v53, %v490_v44 }
 0x322   :  { %v494_v55 = vmul.f32 0.001953125, %v493_v54  ;;  %v1357_v54 = vld [vmem:[%s1713_s1 + $0xd8] sm:$0xff]  }
 0x324   :  { %v495_v56 = vmul.f32 %v494_v55, %v494_v55 }
 0x326   :  { %v497_v57 = vrot.slane %v495_v56, 7  ;;  %v1361_v56 = vld [vmem:[%s1713_s1 + $0xf8] sm:$0xff]  }
 0x328   :  { %v499_v58 = vsub.f32 %v494_v55, %v497_v57  ;;  %v1362_v57 = vld [vmem:[%s1713_s1 + $0x140] sm:$0xff]  }
 0x32a   :  { %v500_v59 = vadd.f32 1e-05, %v499_v58  ;;  %v1363_v58 = vld [vmem:[%s1713_s1 + $0x148] sm:$0xff]  }
 0x32c   :  { %1370 = vrsqrt.f32 %v500_v59  ;;  %v1364_v59 = vld [vmem:[%s1713_s1 + $0x150] sm:$0xff]  }
 0x336   :  { %v1371_v60 = vpop.eup %1370 }
 0x337   :  { %v503_v63 = vrot.slane %v1371_v60, 1  ;;  %v1365_v60 = vld [vmem:[%s1713_s1 + $0x158] sm:$0xff]  }
 0x339   :  { %v505_v1 = vmul.f32 %v503_v63, %v1609_v61  ;;  %v1366_v63 = vld [vmem:[%s1713_s1 + $0x160] sm:$0xff]  }
 0x33b   :  { %v506_v2 = vmul.f32 %v505_v1, %v494_v55  ;;  %v514_v9 = vrot.slane %v505_v1, %v513_v0  ;;  %v1360_v55 = vld [vmem:[%s1713_s1 + $0xf0] sm:$0xff]   ;;  %v1367_v0 = vld [vmem:[%s1713_s1 + $0x168] sm:$0xff]  }
 0x33c   :  { %v1368_v1 = vld [vmem:[%s1713_s1 + $0x170] sm:$0xff]  }
 0x33d   :  { %v508_v13 = vrot.slane %v506_v2, 7  ;;  %v515_v15 = vmul.f32 %v514_v9, %v1556_v6  ;;  %v516_v17 = vmul.f32 %v514_v9, %v1560_v8  ;;  %v517_v20 = vmul.f32 %v1554_v3, %v514_v9  ;;  %v1355_v6 = vld [vmem:[%s1713_s1 + $0xc8] sm:$0xff]   ;;  %v1369_v2 = vld [vmem:[%s1713_s1 + $0x178] sm:$0xff]  }
 0x33e   :  { %v518_v21 = vmul.f32 %v1558_v7, %v514_v9 }
 0x33f   :  { %v510_v14 = vsub.f32 %v1609_v61, %v508_v13 }
 0x341   :  { %v522_v16 = vrot.slane %v510_v14, %v521_v11 }
 0x343   :  { %v523_v22 = vadd.f32 %v522_v16, %v515_v15  ;;  %v524_v23 = vadd.f32 %v522_v16, %v516_v17  ;;  %v525_v24 = vadd.f32 %v522_v16, %v517_v20  ;;  %v526_v25 = vadd.f32 %v522_v16, %v518_v21 }
 0x345   :  { %v527_v26 = vmax.f32 %v523_v22, 0.0  ;;  %v528_v27 = vmax.f32 %v524_v23, 0.0  ;;  %v529_v28 = vmax.f32 %v525_v24, 0.0  ;;  %v530_v29 = vmax.f32 %v526_v25, 0.0 }
 0x347   :  { %v574_v30 = vpack.c.bf16 %v528_v27, %v527_v26  ;;  %v575_v31 = vpack.c.bf16 %v530_v29, %v529_v28  ;;  %v531_v32 = vrot.slane %v527_v26, 7  ;;  %v532_v33 = vrot.slane %v528_v27, 7 }
 0x348   :  { %v534_v8 = vrot.slane %v530_v29, 7  ;;  %v533_v3 = vrot.slane %v529_v28, 7  ;;  %v543_v34 = vrot.slane %v527_v26, 1  ;;  %v544_v7 = vrot.slane %v528_v27, 1 }
 0x349   :  { %1258 = vmatprep.mubr.bf16.mxu1 %v574_v30  ;;  %v537_v35 = vsel %vm85_vm0, %v531_v32, %v532_v33  ;;  %v545_v36 = vrot.slane %v529_v28, 1  ;;  %v546_v37 = vrot.slane %v530_v29, 1 }
 0x34a   :  { %1259 = vmatmul.mubr.bf16.vlgmr.msra.gmra.mrb[0].mxu1 %v575_v31  ;;  %v538_v38 = vsel %vm85_vm0, %v534_v8, %v531_v32  ;;  %v535_v39 = vsel %vm85_vm0, %v533_v3, %v534_v8  ;;  %v536_v41 = vsel %vm85_vm0, %v532_v33, %v533_v3  ;;  %v549_v42 = vsel %vm98_vm2, %v543_v34, %v544_v7 }
 0x34b   :  { %1263 = vmatpush3.bf16.msra.mxu1 %v1354_v52  ;;  %v539_v44 = vsel %vm1451_vm1, %v527_v26, %v538_v38  ;;  %v541_v45 = vsel %vm1494_vm3, %v529_v28, %v536_v41  ;;  %v548_v46 = vsel %vm98_vm2, %v544_v7, %v545_v36  ;;  %v547_v47 = vsel %vm98_vm2, %v545_v36, %v546_v37 }
 0x34c   :  { %1264 = vmatprep.subr.bf16.mxu1 %v1355_v6  ;;  %v555_v48 = vpack.c.bf16 %v537_v35, %v539_v44  ;;  %v556_v50 = vpack.c.bf16 %v535_v39, %v541_v45  ;;  %v552_v19 = vsel %vm1501_vm4, %v528_v27, %v548_v46  ;;  %v550_v40 = vsel %vm98_vm2, %v546_v37, %v543_v34 }
 0x34d   :  { %v787_v51 = vpack.c.bf16 %v552_v19, %v549_v42  ;;  %v554_v52 = vsel %vm1543_vm5, %v530_v29, %v550_v40 }
 0x34e   :  { %1278 = vmatprep.mubr.bf16.mxu1 %v555_v48  ;;  %v788_v53 = vpack.c.bf16 %v554_v52, %v547_v47  ;;  %v964_v52 = vsub.s32 2, %v1428_v10 }
 0x34f   :  { %1265 = vmatpush3.bf16.msra.mxu1 %v1355_v6 }
 0x350   :  { %1266 = vmatprep.subr.bf16.mxu1 %v1356_v49 }
 0x353   :  { %1267 = vmatpush3.bf16.msra.mxu1 %v1356_v49 }
 0x354   :  { %1268 = vmatprep.subr.bf16.mxu1 %v1357_v54 }
 0x357   :  { %1269 = vmatpush3.bf16.msra.mxu1 %v1357_v54 }
 0x358   :  { %1270 = vmatprep.subr.bf16.mxu1 %v1358_v43 }
 0x35b   :  { %1271 = vmatpush3.bf16.msra.mxu1 %v1358_v43 }
 0x35c   :  { %1272 = vmatprep.subr.bf16.mxu1 %v1359_v62 }
 0x35f   :  { %1273 = vmatpush3.bf16.msra.mxu1 %v1359_v62  ;;  %v972_v62 = vsub.s32 3, %v1428_v10 }
 0x360   :  { %1274 = vmatprep.subr.bf16.mxu1 %v1360_v55 }
 0x363   :  { %1275 = vmatpush3.bf16.msra.mxu1 %v1360_v55 }
 0x364   :  { %1276 = vmatprep.subr.bf16.mxu1 %v1361_v56 }
 0x367   :  { %1277 = vmatpush3.bf16.msra.mxu1 %v1361_v56 }
 0x368   :  { %1282 = vmatprep.subr.bf16.mxu1 %v1362_v57 }
 0x36a   :  { %1279 = vmatmul.mubr.bf16.vlgmr.msra.gmra.mrb[0].mxu1 %v556_v50 }
 0x36b   :  { %1283 = vmatpush3.bf16.msra.mxu1 %v1362_v57  ;;  %1298 = vmatprep.mubr.bf16.mxu1 %v787_v51 }
 0x36c   :  { %1284 = vmatprep.subr.bf16.mxu1 %v1363_v58 }
 0x36f   :  { %1285 = vmatpush3.bf16.msra.mxu1 %v1363_v58 }
 0x370   :  { %1286 = vmatprep.subr.bf16.mxu1 %v1364_v59 }
 0x373   :  { %1287 = vmatpush3.bf16.msra.mxu1 %v1364_v59 }
 0x374   :  { %1288 = vmatprep.subr.bf16.mxu1 %v1365_v60 }
 0x377   :  { %1289 = vmatpush3.bf16.msra.mxu1 %v1365_v60 }
 0x378   :  { %1290 = vmatprep.subr.bf16.mxu1 %v1366_v63 }
 0x37b   :  { %1291 = vmatpush3.bf16.msra.mxu1 %v1366_v63 }
 0x37c   :  { %1292 = vmatprep.subr.bf16.mxu1 %v1367_v0 }
 0x37f   :  { %1293 = vmatpush3.bf16.msra.mxu1 %v1367_v0 }
 0x380   :  { %1294 = vmatprep.subr.bf16.mxu1 %v1368_v1 }
 0x383   :  { %1295 = vmatpush3.bf16.msra.mxu1 %v1368_v1 }
 0x384   :  { %1296 = vmatprep.subr.bf16.mxu1 %v1369_v2 }
 0x387   :  { %1297 = vmatpush3.bf16.msra.mxu1 %v1369_v2 }
 0x38a   :  { %1299 = vmatmul.mubr.bf16.vlgmr.msra.gmra.mrb[0].mxu1 %v788_v53 }
 0x45d   :  { %v1300_v9 = vpop.f32.mrb[0].mxu1 }
 0x45e   :  { %v888_v11 = vpop.f32.mrb[1].mxu1  ;;  %v918_v20 = vmul.f32 %v1300_v9, %v1300_v9 }
 0x45f   :  { %v1301_v13 = vpop.f32.mrb[2].mxu1  ;;  %v916_v15 = vmul.f32 %v888_v11, %v888_v11 }
 0x460   :  { %v891_v14 = vpop.f32.mrb[3].mxu1  ;;  %v919_v23 = vmul.f32 %v1301_v13, %v1301_v13 }
 0x461   :  { %v907_v16 = vadd.f32 %v891_v14, %v888_v11  ;;  %v917_v17 = vmul.f32 %v891_v14, %v891_v14 }
 0x463   :  { %v908_v21 = vadd.f32 %v1300_v9, %v907_v16  ;;  %v920_v22 = vadd.f32 %v917_v17, %v916_v15 }
 0x465   :  { %v909_v24 = vadd.f32 %v1301_v13, %v908_v21  ;;  %v921_v25 = vadd.f32 %v920_v22, %v918_v20 }
 0x467   :  { %v910_v26 = vrot.slane %v909_v24, 4  ;;  %v922_v27 = vadd.f32 %v921_v25, %v919_v23 }
 0x469   :  { %v911_v28 = vadd.f32 %v910_v26, %v909_v24  ;;  %v923_v29 = vrot.slane %v922_v27, 4 }
 0x46b   :  { %v912_v30 = vrot.slane %v911_v28, 2  ;;  %v924_v31 = vadd.f32 %v923_v29, %v922_v27 }
 0x46d   :  { %v913_v32 = vadd.f32 %v912_v30, %v911_v28  ;;  %v925_v33 = vrot.slane %v924_v31, 2 }
 0x46f   :  { %v914_v6 = vrot.slane %v913_v32, 1  ;;  %v926_v8 = vadd.f32 %v925_v33, %v924_v31 }
 0x471   :  { %v927_v3 = vrot.slane %v926_v8, 1  ;;  %v915_v34 = vadd.f32 %v914_v6, %v913_v32 }
 0x473   :  { %v928_v7 = vadd.f32 %v927_v3, %v926_v8 }
 0x475   :  { %v929_v35 = vsel %vm480_vm6, %v915_v34, %v928_v7 }
 0x476   :  { %930 = vrot.lane.b32.xlu0 %v929_v35, %s1374_s12 }
 0x4e8   :  { %v931_v36 = vpop.permute.xlu0 %930 }
 0x4e9   :  { %v932_v37 = vadd.f32 %v931_v36, %v929_v35 }
 0x4eb   :  { %933 = vrot.lane.b32.xlu1 %v932_v37, %s1375_s13 }
 0x55d   :  { %v934_v38 = vpop.permute.xlu1 %933 }
 0x55e   :  { %v935_v39 = vadd.f32 %v934_v38, %v932_v37 }
 0x560   :  { %936 = vrot.lane.b32.xlu0 %v935_v39, %s1376_s14 }
 0x5d2   :  { %v937_v41 = vpop.permute.xlu0 %936 }
 0x5d3   :  { %v938_v42 = vadd.f32 %v937_v41, %v935_v39 }
 0x5d5   :  { %939 = vrot.lane.b32.xlu1 %v938_v42, %s1377_s19 }
 0x647   :  { %v940_v44 = vpop.permute.xlu1 %939 }
 0x648   :  { %v941_v45 = vadd.f32 %v940_v44, %v938_v42 }
 0x64a   :  { %v942_v46 = vmul.f32 0.001953125, %v941_v45 }
 0x64c   :  { %v943_v47 = vmul.f32 %v942_v46, %v942_v46 }
 0x64e   :  { %v945_v48 = vrot.slane %v943_v47, 7 }
 0x650   :  { %v947_v49 = vsub.f32 %v942_v46, %v945_v48 }
 0x652   :  { %v948_v50 = vadd.f32 1e-05, %v947_v49 }
 0x654   :  { %1372 = vrsqrt.f32 %v948_v50 }
 0x65e   :  { %v1373_v19 = vpop.eup %1372 }
 0x65f   :  { %v951_v40 = vrot.slane %v1373_v19, 7 }
 0x661   :  { %v953_v51 = vmul.f32 %v951_v40, %v1609_v61 }
 0x663   :  { %v955_v53 = vrot.slane %v953_v51, 2  ;;  %v965_v43 = vrot.slane %v953_v51, %v964_v52 }
 0x665   :  { %v957_v54 = vmul.f32 %v955_v53, %v942_v46  ;;  %v966_v57 = vmul.f32 %v965_v43, %v888_v11  ;;  %v967_v58 = vmul.f32 %v965_v43, %v891_v14  ;;  %v968_v59 = vmul.f32 %v1300_v9, %v965_v43 }
 0x666   :  { %v969_v60 = vmul.f32 %v1301_v13, %v965_v43 }
 0x667   :  { %v959_v55 = vrot.slane %v957_v54, 5 }
 0x669   :  { %v961_v56 = vsub.f32 %v1609_v61, %v959_v55 }
 0x66b   :  { %v973_v63 = vrot.slane %v961_v56, %v972_v62 }
 0x66d   :  { %v974_v0 = vadd.f32 %v973_v63, %v966_v57  ;;  %v975_v1 = vadd.f32 %v973_v63, %v967_v58  ;;  %v976_v2 = vadd.f32 %v973_v63, %v968_v59  ;;  %v977_v15 = vadd.f32 %v973_v63, %v969_v60 }
 0x66f   :  { %v978_v16 = vadd.f32 %v974_v0, %v1413_v4  ;;  %v979_v17 = vadd.f32 %v975_v1, %v1418_v5  ;;  %v980_v20 = vadd.f32 %v976_v2, %v1449_v18  ;;  %v981_v10 = vadd.f32 %v977_v15, %v1436_v12 }
 0x671   :  { %v982_v21 = vmax.f32 %v978_v16, 0.0  ;;  %v983_v22 = vmax.f32 %v979_v17, 0.0  ;;  %v984_v61 = vmax.f32 %v980_v20, 0.0  ;;  %v985_v11 = vmax.f32 %v981_v10, 0.0 }
 0x673   :  { %986 = vst [vmem:[%s1716_s3] sm:$0xff] %v982_v21  ;;  %987 = vst [vmem:[%s1716_s3 + $0x8] sm:$0xff] %v983_v22 }
 0x674   :  { %988 = vst [vmem:[%s1716_s3 + $0x10] sm:$0xff] %v984_v61  ;;  %989 = vst [vmem:[%s1716_s3 + $0x18] sm:$0xff] %v985_v11 }

</bundles_post_ra>
